<compile_context>
chip_gen: v7x
topology: tpu7x:2x2x1
jax: 0.10.0
libtpu: 0.0.40
codegen_flags: <defaults>
</compile_context>

<pallas_src>
import jax
import jax.numpy as jnp
from jax.experimental import pallas as pl
from jax.experimental.pallas import tpu as pltpu


_HAS_EINSHAPE = hasattr(pltpu, "einshape")


def _round_up(x, m):
    return ((x + m - 1) // m) * m


def _bsg_to_bgs(x):
    """(B, steps, n_group) -> (B, n_group, steps) minor-dim swap.

    Prefer the lane-layout-aware einshape lowering; fall back to
    jnp.transpose if einshape is unavailable or rejects the equation."""
    if _HAS_EINSHAPE:
        try:
            return pltpu.einshape("bsg->bgs", x)
        except Exception:  # pragma: no cover - older jax without this path
            pass
    return jnp.transpose(x, (0, 2, 1))


def _deinterleave_kernel(audio_ref, out_ref):
    # audio_ref: (B, step_tile * n_group)  lane-dense raw audio slab
    # out_ref:   (B, n_group, step_tile)   lane-dense squeezed output
    B, n_group, step_tile = out_ref.shape
    x = audio_ref[...].reshape(B, step_tile, n_group)  # split minor dim
    out_ref[...] = _bsg_to_bgs(x)                      # XLU shuffle, one store stream


def _pick_step_tile(B, steps, n_group, itemsize, per_operand_budget=4 << 20):
    """Pick a lane-dense (multiple-of-128) tile along the step axis.

    Uses *padded* VMEM block sizes:
      input  block (B, tile*n_group): B padded to a sublane multiple, lane-dense
      output block (B, n_group, tile): n_group padded to a sublane multiple
    and keeps the larger padded operand under `per_operand_budget` so the
    double-buffered in+out working set stays comfortably inside scoped VMEM
    on v5e/v6e (128 MiB) and v7x (64 MiB)."""
    if steps <= 128:
        return steps  # full-extent block: always legal, nothing to split
    sub = max(8, 32 // max(1, itemsize))  # sublane multiple for this dtype
    in_bytes_per_128 = _round_up(B, sub) * 128 * n_group * itemsize
    out_bytes_per_128 = B * _round_up(n_group, sub) * 128 * itemsize
    per_128 = max(in_bytes_per_128, out_bytes_per_128)
    tile = 128 * max(1, per_operand_budget // per_128)
    # v7x has 2 TensorCores: keep >= 2 parallel grid steps when possible
    # (no effect on v5e/v6e, which have a single TC).
    tile = min(tile, _round_up(pl.cdiv(steps, 2), 128))
    tile = max(128, min(tile, _round_up(steps, 128)))
    return tile


def squeezer_forward(audio, spect, n_group):
    """Pallas equivalent of Squeezer.forward.

    audio: (B, T) with T divisible by n_group
    spect: (B, n_mel, group_steps)
    returns (audio_sq (B, n_group, steps), spect_sq (B, n_mel, steps))
    """
    B, T = audio.shape
    assert T % n_group == 0, "audio length must be divisible by n_group"
    steps = T // n_group
    _, n_mel, group_steps = spect.shape
    assert steps <= group_steps  # mirrors the torch assert

    # spect "squeeze" is a pure slice -> plain XLA, no kernel involvement.
    spect_sq = spect[..., :steps]

    itemsize = jnp.dtype(audio.dtype).itemsize
    step_tile = _pick_step_tile(B, steps, n_group, itemsize)
    num_tiles = pl.cdiv(steps, step_tile)

    # Padded VMEM block bytes -> explicit, shape-derived scoped-VMEM limit.
    sub = max(8, 32 // max(1, itemsize))
    in_block_bytes = _round_up(B, sub) * _round_up(step_tile * n_group, 128) * itemsize
    out_block_bytes = B * _round_up(n_group, sub) * _round_up(step_tile, 128) * itemsize
    working_set = 2 * (in_block_bytes + out_block_bytes)  # double-buffered in + out
    vmem_limit = int(min(64 << 20, max(2 * working_set, 8 << 20)))

    bytes_accessed = 2 * B * T * itemsize  # read audio once, write it once

    audio_sq = pl.pallas_call(
        _deinterleave_kernel,
        out_shape=jax.ShapeDtypeStruct((B, n_group, steps), audio.dtype),
        grid_spec=pltpu.PrefetchScalarGridSpec(
            num_scalar_prefetch=0,
            grid=(num_tiles,),
            in_specs=[
                # Lane-dense input slab: whole batch, step_tile*n_group samples.
                pl.BlockSpec((B, step_tile * n_group), lambda s: (0, s)),
            ],
            # Lane-dense output block (full-width stores; only the ragged edge
            # block, if any, is masked by Pallas).
            out_specs=pl.BlockSpec((B, n_group, step_tile), lambda s: (0, 0, s)),
        ),
        compiler_params=pltpu.CompilerParams(
            dimension_semantics=("parallel",),
            vmem_limit_bytes=vmem_limit,
        ),
        cost_estimate=pl.CostEstimate(
            flops=0, transcendentals=0, bytes_accessed=bytes_accessed
        ),
    )(audio)

    return audio_sq, spect_sq


if __name__ == "__main__":
    key = jax.random.PRNGKey(0)

    def run_case(B, n_group, steps, n_mel, group_steps, k):
        ka, ks = jax.random.split(k)
        T = steps * n_group
        audio = jax.random.normal(ka, (B, T), dtype=jnp.float32)
        spect = jax.random.normal(ks, (B, n_mel, group_steps), dtype=jnp.float32)

        audio_sq, spect_sq = squeezer_forward(audio, spect, n_group)
        jax.block_until_ready((audio_sq, spect_sq))

        # Reference check against pure-JAX semantics (mirrors the torch code).
        ref_audio = jnp.transpose(audio.reshape(B, -1, n_group), (0, 2, 1))
        ref_spect = spect[..., : ref_audio.shape[2]]
        assert audio_sq.shape == (B, n_group, steps)
        assert spect_sq.shape == (B, n_mel, steps)
        assert jnp.array_equal(audio_sq, ref_audio)
        assert jnp.array_equal(spect_sq, ref_spect)

    k1, k2 = jax.random.split(key)
    # Even case: steps a multiple of 128 (single lane-dense tile).
    run_case(B=2, n_group=8, steps=128, n_mel=16, group_steps=160, k=k1)
    # Ragged case: steps not a multiple of 128 (cdiv grid, masked edge block).
    run_case(B=2, n_group=8, steps=320, n_mel=16, group_steps=336, k=k2)

    print("KERNEL_OK")
</pallas_src>

<mosaic_0001>
module attributes {stable_mosaic.version = 11 : i64} {
  func.func @_deinterleave_kernel(%arg0: i32, %arg1: memref<2x1024xf32, #tpu.memory_space<vmem>>, %arg2: memref<2x8x128xf32, #tpu.memory_space<vmem>>) attributes {dimension_semantics = [#tpu.dimension_semantics<parallel>], iteration_bounds = array<i64: 1>, scalar_prefetch = 0 : i64, scratch_operands = 0 : i64, tpu.core_type = #tpu.core_type<tc>, window_params = [{transform_indices = @transform_0, window_bounds = array<i64: 2, 1024>}, {transform_indices = @transform_1, window_bounds = array<i64: 2, 8, 128>}]} {
    %c0 = arith.constant 0 : index
    %c0_0 = arith.constant 0 : index
    %0 = vector.load %arg1[%c0, %c0_0] : memref<2x1024xf32, #tpu.memory_space<vmem>>, vector<2x1024xf32>
    %1 = vector.shape_cast %0 : vector<2x1024xf32> to vector<2x128x8xf32>
    %2 = tpu.transpose %1, [0, 2, 1] : vector<2x128x8xf32> -> vector<2x8x128xf32>
    %c0_1 = arith.constant 0 : index
    %c0_2 = arith.constant 0 : index
    %c0_3 = arith.constant 0 : index
    %3 = vector.load %arg2[%c0_1, %c0_2, %c0_3] : memref<2x8x128xf32, #tpu.memory_space<vmem>>, vector<2x8x128xf32>
    tpu.vector_store %arg2[%c0_1, %c0_2, %c0_3], %2 {strides = array<i32>} : memref<2x8x128xf32, #tpu.memory_space<vmem>>, vector<2x8x128xf32>,
    return
  }
  func.func @transform_0(%arg0: i32) -> (i32, i32) {
    %c0_i32 = arith.constant 0 : i32
    %c0_i32_0 = arith.constant 0 : i32
    return %c0_i32, %arg0 : i32, i32
  }
  func.func @transform_1(%arg0: i32) -> (i32, i32, i32) {
    %c0_i32 = arith.constant 0 : i32
    %c0_i32_0 = arith.constant 0 : i32
    %c0_i32_1 = arith.constant 0 : i32
    return %c0_i32, %c0_i32_0, %arg0 : i32, i32, i32
  }
}

</mosaic_0001>

<bundles_post_ra>
// kernel: tpu_custom_call.1
= control target key start
LH: loop header
LB: loop body
LE: loop exit
PB: predicated region body
PF: predicated region fallthrough
CT: control target
= control target key end

     0   :  { %6 = vsyncpa [#allocation3], 0  ;;  %s2349_s0 = inlined_call_operand.hbm [shape: f32[2,1024], index: 0, kind: input, shape index: {}]   ;;  %s2350_s1 = inlined_call_operand.hbm [shape: f32[2,8,128], index: 1, kind: output, shape index: {}]  }
   0x1   :  { %7 = vsyncpa [#allocation4], 0  ;;  %s1770_s6 = smov [#allocation2]   ;;  %s1722_s10 = scalar_lea.hbm %s2349_s0, 256 }
   0x2   :  { %s14_s7 = sshll.u32 %s1770_s6, 4  ;;  %p1723_p0 = scmp.ne.s32.totalorder %s2349_s0, %s1722_s10  ;;  %s15_s7 = int_to_ptr.vmem [resolvable:$true] %s14_s7 }
   0x3   :  { %p1726_p1 = scmp.lt.u32.totalorder %s1722_s10, %s2349_s0 }
   0x5   :  { %p1728_p2 = pnand %p1726_p1, %p1723_p0 }
   0x7   :  { %1731 = shalt.err (!%p1728_p2)
}
   0x8   :  { %s1732_s15 = scalar_lea.vmem %s15_s7, 256  ;;  %p1737_p4 = scmp.lt.s32.totalorder %s15_s7, %s15_s7 }
   0x9   :  { %p1733_p3 = scmp.ne.s32.totalorder %s15_s7, %s1732_s15  ;;  %p1738_p5 = scmp.lt.s32.totalorder %s1732_s15, %s1732_s15 }
   0xb   :  { %p1739_p6 = por %p1738_p5, %p1737_p4 }
   0xd   :  { %p1740_p7 = pnand %p1739_p6, %p1733_p3 }
   0xf   :  { %1743 = shalt.err (!%p1740_p7)
}
  0x10   :  { %17 = dma.hbm_to_vmem [thread:$0]  %s2349_s0, 256, %s15_s7, [#allocation3]  }
  0x11   :  { %1766 = dma.done.wait [#allocation3], 256  }
  0x12   :  { %1767 = vsyncadd [#allocation3], 4294967040  ;;  %v1812_v0 = vld [vmem:[#allocation2] sm:$0xff]  ;;  %s1771_s18 = smov 104   ;;  %s1772_s19 = smov 120   ;;  %v1830_v1 = vld [vmem:[#allocation2 + $0x8] sm:$0xff]  ;;  %v311_v6 = vlaneseq }
  0x13   :  { %34 = vrot.lane.b32.xlu1 %v1812_v0, %s1771_s18  ;;  %26 = vrot.lane.b32.xlu0 %v1812_v0, %s1772_s19  ;;  %s1773_s20 = smov 96   ;;  %s1774_s21 = smov 112   ;;  %v1786_v4 = vmov 1934713408   ;;  %v1787_v9 = vmov 1983009808  }
  0x14   :  { %s1775_s22 = smov 80   ;;  %s1776_s0 = smov 88   ;;  %v309_v5 = vunpack.c.l.s4 %v1786_v4  ;;  %v1014_v10 = vunpack.c.l.s4 %v1787_v9  ;;  %v312_v12 = vshrl.u32 %v311_v6, 7  ;;  %v24_v13 = vrot.slane %v1812_v0, 2 }
  0x15   :  { %s1777_s23 = smov 64   ;;  %s1778_s24 = smov 72   ;;  %v86_v20 = vrot.slane %v1812_v0, 4  ;;  %v118_v23 = vrot.slane %v1812_v0, 6  ;;  %v151_v36 = vrot.slane %v1830_v1, 2  ;;  %v213_v37 = vrot.slane %v1830_v1, 4 }
  0x16   :  { %s1779_s25 = smov 48   ;;  %s1780_s26 = smov 56   ;;  %v310_v11 = vunpack.c.0.s8 %v309_v5  ;;  %v1015_v17 = vunpack.c.0.s8 %v1014_v10  ;;  %v245_v41 = vrot.slane %v1830_v1, 6 }
  0x17   :  { %38 = vrot.lane.b32.xlu1 %v1812_v0, %s1773_s20  ;;  %30 = vrot.lane.b32.xlu0 %v1812_v0, %s1774_s21  ;;  %s1781_s27 = smov 32   ;;  %s1782_s28 = smov 40  }
  0x18   :  { %s1783_s29 = smov 16   ;;  %s1784_s30 = smov 24   ;;  %v1857_v19 = vsub.s32 %v310_v11, %v312_v12  ;;  %v1866_v33 = vsub.s32 %v1015_v17, %v312_v12 }
  0x19   :  { %s1785_s2 = smov 8   ;;  %s1788_s3 = smov [#allocation5]  }
  0x1a   :  { %s1658_s4 = sshll.u32 %s1788_s3, 4  ;;  %s1659_s4 = int_to_ptr.vmem [resolvable:$true] %s1658_s4 }
  0x1b   :  { %46 = vrot.lane.b32.xlu1 %v1812_v0, %s1775_s22  ;;  %42 = vrot.lane.b32.xlu0 %v1812_v0, %s1776_s0  ;;  %s1744_s5 = scalar_lea.vmem %s1659_s4, 256  ;;  %p1749_p9 = scmp.lt.s32.totalorder %s1659_s4, %s1659_s4 }
  0x1c   :  { %p1745_p8 = scmp.ne.s32.totalorder %s1659_s4, %s1744_s5  ;;  %p1750_p10 = scmp.lt.s32.totalorder %s1744_s5, %s1744_s5 }
  0x1e   :  { %p1751_p11 = por %p1750_p10, %p1749_p9 }
  0x1f   :  { %54 = vrot.lane.b32.xlu1 %v1812_v0, %s1777_s23  ;;  %50 = vrot.lane.b32.xlu0 %v1812_v0, %s1778_s24 }
  0x20   :  { %p1752_p12 = pnand %p1751_p11, %p1745_p8 }
  0x23   :  { %62 = vrot.lane.b32.xlu1 %v1812_v0, %s1779_s25  ;;  %58 = vrot.lane.b32.xlu0 %v1812_v0, %s1780_s26 }
  0x27   :  { %70 = vrot.lane.b32.xlu1 %v1812_v0, %s1781_s27  ;;  %66 = vrot.lane.b32.xlu0 %v1812_v0, %s1782_s28 }
  0x2b   :  { %78 = vrot.lane.b32.xlu1 %v1812_v0, %s1783_s29  ;;  %74 = vrot.lane.b32.xlu0 %v1812_v0, %s1784_s30 }
  0x2f   :  { %153 = vrot.lane.b32.xlu1 %v1830_v1, %s1772_s19  ;;  %82 = vrot.lane.b32.xlu0 %v1812_v0, %s1785_s2 }
  0x33   :  { %161 = vrot.lane.b32.xlu1 %v1830_v1, %s1771_s18  ;;  %157 = vrot.lane.b32.xlu0 %v1830_v1, %s1774_s21 }
  0x37   :  { %169 = vrot.lane.b32.xlu1 %v1830_v1, %s1776_s0  ;;  %165 = vrot.lane.b32.xlu0 %v1830_v1, %s1773_s20 }
  0x3b   :  { %177 = vrot.lane.b32.xlu1 %v1830_v1, %s1778_s24  ;;  %173 = vrot.lane.b32.xlu0 %v1830_v1, %s1775_s22 }
  0x3f   :  { %185 = vrot.lane.b32.xlu1 %v1830_v1, %s1780_s26  ;;  %181 = vrot.lane.b32.xlu0 %v1830_v1, %s1777_s23 }
  0x43   :  { %193 = vrot.lane.b32.xlu1 %v1830_v1, %s1782_s28  ;;  %189 = vrot.lane.b32.xlu0 %v1830_v1, %s1779_s25 }
  0x47   :  { %201 = vrot.lane.b32.xlu1 %v1830_v1, %s1784_s30  ;;  %197 = vrot.lane.b32.xlu0 %v1830_v1, %s1781_s27 }
  0x4b   :  { %209 = vrot.lane.b32.xlu1 %v1830_v1, %s1785_s2  ;;  %205 = vrot.lane.b32.xlu0 %v1830_v1, %s1783_s29 }
  0x85   :  { %v35_v2 = vpop.permute.xlu1 %34  ;;  %v27_v3 = vpop.permute.xlu0 %26 }
  0x86   :  { %v28_v14 = vrot.slane %v27_v3, 2  ;;  %v36_v18 = vrot.slane %v35_v2, 2  ;;  %v88_v22 = vrot.slane %v27_v3, 4  ;;  %v120_v24 = vrot.slane %v27_v3, 6 }
  0x87   :  { %v307_v25 = vcombine.low %v1812_v0, %v27_v3  ;;  %v92_v26 = vrot.slane %v35_v2, 4  ;;  %v124_v31 = vrot.slane %v35_v2, 6 }
  0x88   :  { %v379_v27 = vcombine.low %v24_v13, %v28_v14  ;;  %v451_v38 = vcombine.low %v86_v20, %v88_v22  ;;  %v523_v39 = vcombine.low %v118_v23, %v120_v24 }
  0x89   :  { %v1852_v7 = vpop.permute.xlu1 %38  ;;  %v31_v8 = vpop.permute.xlu0 %30  ;;  %v314_v40 = vrot.slane %v307_v25, %v1857_v19 }
  0x8a   :  { %v32_v21 = vrot.slane %v31_v8, 2  ;;  %v90_v28 = vrot.slane %v31_v8, 4  ;;  %v122_v32 = vrot.slane %v31_v8, 6  ;;  %v316_v34 = vcombine.low %v31_v8, %v35_v2 }
  0x8b   :  { %v1873_v42 = vrot.slane %v379_v27, %v1857_v19  ;;  %v40_v43 = vrot.slane %v1852_v7, 2  ;;  %v94_v48 = vrot.slane %v1852_v7, 4  ;;  %v126_v52 = vrot.slane %v1852_v7, 6 }
  0x8c   :  { %v388_v35 = vcombine.low %v32_v21, %v36_v18  ;;  %v460_v44 = vcombine.low %v90_v28, %v92_v26  ;;  %v532_v49 = vcombine.low %v122_v32, %v124_v31  ;;  %v323_v55 = vrot.slane %v316_v34, %v1857_v19 }
  0x8d   :  { %v1855_v15 = vpop.permute.xlu1 %46  ;;  %v43_v16 = vpop.permute.xlu0 %42  ;;  %v1890_v56 = vrot.slane %v451_v38, %v1857_v19  ;;  %v1893_v57 = vrot.slane %v523_v39, %v1857_v19 }
  0x8e   :  { %v44_v50 = vrot.slane %v43_v16, 2  ;;  %v96_v51 = vrot.slane %v43_v16, 4  ;;  %v1885_v53 = vrot.slane %v388_v35, %v1857_v19  ;;  %v325_v54 = vcombine.low %v1852_v7, %v43_v16 }
  0x8f   :  { %v48_v58 = vrot.slane %v1855_v15, 2  ;;  %v128_v59 = vrot.slane %v43_v16, 6  ;;  %v1897_v60 = vrot.slane %v460_v44, %v1857_v19  ;;  %v98_v61 = vrot.slane %v1855_v15, 4 }
  0x90   :  { %v130_v62 = vrot.slane %v1855_v15, 6  ;;  %v1907_v3 = vrot.slane %v532_v49, %v1857_v19  ;;  %v397_v4 = vcombine.low %v40_v43, %v44_v50  ;;  %v469_v5 = vcombine.low %v94_v48, %v96_v51 }
  0x91   :  { %v1862_v29 = vpop.permute.xlu1 %54  ;;  %v1864_v30 = vpop.permute.xlu0 %50  ;;  %v332_v7 = vrot.slane %v325_v54, %v1857_v19  ;;  %v1670_v8 = vcombine.high %v314_v40, %v323_v55  ;;  %v1011_v9 = vcombine.low %v314_v40, %v323_v55  ;;  %v1674_v10 = vcombine.high %v1873_v42, %v1885_v53 }
  0x92   :  { %v334_v45 = vcombine.low %v1855_v15, %v1864_v30  ;;  %v52_v6 = vrot.slane %v1864_v30, 2  ;;  %v541_v11 = vcombine.low %v126_v52, %v128_v59  ;;  %v100_v12 = vrot.slane %v1864_v30, 4 }
  0x93   :  { %v132_v13 = vrot.slane %v1864_v30, 6  ;;  %v1045_v14 = vcombine.low %v1873_v42, %v1885_v53  ;;  %v56_v15 = vrot.slane %v1862_v29, 2  ;;  %v102_v16 = vrot.slane %v1862_v29, 4 }
  0x94   :  { %v341_v2 = vrot.slane %v334_v45, %v1857_v19  ;;  %v134_v22 = vrot.slane %v1862_v29, 6  ;;  %v406_v23 = vcombine.low %v48_v58, %v52_v6  ;;  %v1291_v26 = vrot.slane %v1670_v8, %v1866_v33 }
  0x95   :  { %v1878_v46 = vpop.permute.xlu1 %62  ;;  %v1880_v47 = vpop.permute.xlu0 %58  ;;  %v1019_v28 = vrot.slane %v1011_v9, %v1866_v33  ;;  %v1931_v31 = vrot.slane %v397_v4, %v1857_v19  ;;  %v478_v32 = vcombine.low %v98_v61, %v100_v12  ;;  %v550_v34 = vcombine.low %v130_v62, %v132_v13 }
  0x96   :  { %v1671_v17 = vcombine.high %v332_v7, %v341_v2  ;;  %v1012_v18 = vcombine.low %v332_v7, %v341_v2  ;;  %v60_v24 = vrot.slane %v1880_v47, 2  ;;  %v104_v25 = vrot.slane %v1880_v47, 4 }
  0x97   :  { %v136_v35 = vrot.slane %v1880_v47, 6  ;;  %v1935_v38 = vrot.slane %v469_v5, %v1857_v19  ;;  %v343_v39 = vcombine.low %v1862_v29, %v1880_v47  ;;  %v1944_v48 = vrot.slane %v541_v11, %v1857_v19 }
  0x98   :  { %v1298_v27 = vrot.slane %v1671_v17, %v1866_v33  ;;  %v1026_v30 = vrot.slane %v1012_v18, %v1866_v33  ;;  %v64_v49 = vrot.slane %v1878_v46, 2  ;;  %v415_v50 = vcombine.low %v56_v15, %v60_v24 }
  0x99   :  { %v1901_v63 = vpop.permute.xlu1 %70  ;;  %v1903_v0 = vpop.permute.xlu0 %66  ;;  %v1949_v52 = vrot.slane %v406_v23, %v1857_v19  ;;  %v106_v54 = vrot.slane %v1878_v46, 4  ;;  %v138_v29 = vrot.slane %v1878_v46, 6  ;;  %v487_v47 = vcombine.low %v102_v16, %v104_v25 }
  0x9a   :  { %v1299_v40 = vcombine.low %v1291_v26, %v1298_v27  ;;  %v1027_v43 = vcombine.low %v1019_v28, %v1026_v30  ;;  %v68_v51 = vrot.slane %v1903_v0, 2  ;;  %v1954_v55 = vrot.slane %v478_v32, %v1857_v19 }
  0x9b   :  { %v1957_v58 = vrot.slane %v550_v34, %v1857_v19  ;;  %v559_v59 = vcombine.low %v134_v22, %v136_v35  ;;  %v108_v61 = vrot.slane %v1903_v0, 4  ;;  %v350_v62 = vrot.slane %v343_v39, %v1857_v19 }
  0x9c   :  { %1619 = vxpose.xlu1.b32.start [1/16] (narrow) %v1299_v40, 8  ;;  %1587 = vxpose.xlu0.b32.start [1/16] (narrow) %v1027_v43, 8  ;;  %v72_v2 = vrot.slane %v1901_v63, 2  ;;  %v110_v4 = vrot.slane %v1901_v63, 4  ;;  %v140_v5 = vrot.slane %v1903_v0, 6  ;;  %v1969_v8 = vrot.slane %v415_v50, %v1857_v19 }
  0x9d   :  { %v1919_v20 = vpop.permute.xlu1 %78  ;;  %v1921_v21 = vpop.permute.xlu0 %74  ;;  %v352_v9 = vcombine.low %v1878_v46, %v1903_v0  ;;  %v424_v11 = vcombine.low %v64_v49, %v68_v51  ;;  %v1975_v13 = vrot.slane %v487_v47, %v1857_v19  ;;  %v142_v15 = vrot.slane %v1901_v63, 6 }
  0x9e   :  { %v76_v12 = vrot.slane %v1921_v21, 2  ;;  %v112_v16 = vrot.slane %v1921_v21, 4  ;;  %v1982_v18 = vrot.slane %v559_v59, %v1857_v19  ;;  %v496_v22 = vcombine.low %v106_v54, %v108_v61 }
  0x9f   :  { %v144_v23 = vrot.slane %v1921_v21, 6  ;;  %v568_v0 = vcombine.low %v138_v29, %v140_v5  ;;  %v361_v24 = vcombine.low %v1901_v63, %v1921_v21  ;;  %v1675_v26 = vcombine.high %v1931_v31, %v1949_v52 }
  0xa0   :  { %v359_v27 = vrot.slane %v352_v9, %v1857_v19  ;;  %v1993_v28 = vrot.slane %v424_v11, %v1857_v19  ;;  %v80_v30 = vrot.slane %v1919_v20, 2  ;;  %v433_v32 = vcombine.low %v72_v2, %v76_v12 }
  0xa1   :  { %v1939_v44 = vpop.permute.xlu1 %153  ;;  %v1941_v45 = vpop.permute.xlu0 %82  ;;  %v114_v39 = vrot.slane %v1919_v20, 4  ;;  %v505_v63 = vcombine.low %v110_v4, %v112_v16  ;;  %v2004_v43 = vrot.slane %v496_v22, %v1857_v19  ;;  %v577_v49 = vcombine.low %v142_v15, %v144_v23 }
  0xa2   :  { %v370_v17 = vcombine.low %v1919_v20, %v1941_v45  ;;  %v155_v46 = vrot.slane %v1939_v44, 2  ;;  %v215_v25 = vrot.slane %v1939_v44, 4  ;;  %v247_v21 = vrot.slane %v1939_v44, 6 }
  0xa3   :  { %v595_v50 = vcombine.low %v1830_v1, %v1939_v44  ;;  %v2011_v54 = vrot.slane %v568_v0, %v1857_v19  ;;  %v146_v29 = vrot.slane %v1919_v20, 6  ;;  %v368_v47 = vrot.slane %v361_v24, %v1857_v19 }
  0xa4   :  { %v377_v40 = vrot.slane %v370_v17, %v1857_v19  ;;  %v667_v51 = vcombine.low %v151_v36, %v155_v46  ;;  %v739_v59 = vcombine.low %v213_v37, %v215_v25  ;;  %v2018_v61 = vrot.slane %v433_v32, %v1857_v19 }
  0xa5   :  { %v1964_v6 = vpop.permute.xlu1 %161  ;;  %v1966_v7 = vpop.permute.xlu0 %157  ;;  %v84_v2 = vrot.slane %v1941_v45, 2  ;;  %v116_v44 = vrot.slane %v1941_v45, 4  ;;  %v1672_v4 = vcombine.high %v350_v62, %v359_v27  ;;  %v2023_v36 = vrot.slane %v505_v63, %v1857_v19 }
  0xa6   :  { %v811_v5 = vcombine.low %v245_v41, %v247_v21  ;;  %v1673_v20 = vcombine.high %v368_v47, %v377_v40  ;;  %v1028_v9 = vcombine.low %v350_v62, %v359_v27  ;;  %v2028_v11 = vrot.slane %v577_v49, %v1857_v19 }
  0xa7   :  { %v2031_v37 = vrot.slane %v595_v50, %v1857_v19  ;;  %v2034_v12 = vrot.slane %v667_v51, %v1857_v19  ;;  %v1029_v15 = vcombine.low %v368_v47, %v377_v40  ;;  %v2041_v22 = vrot.slane %v739_v59, %v1857_v19 }
  0xa8   :  { %v148_v1 = vrot.slane %v1941_v45, 6  ;;  %v1308_v41 = vrot.slane %v1672_v4, %v1866_v33  ;;  %v1315_v62 = vrot.slane %v1673_v20, %v1866_v33  ;;  %v442_v23 = vcombine.low %v80_v30, %v84_v2 }
  0xa9   :  { %v1996_v34 = vpop.permute.xlu1 %169  ;;  %v1998_v35 = vpop.permute.xlu0 %165  ;;  %v514_v46 = vcombine.low %v114_v39, %v116_v44  ;;  %v1036_v0 = vrot.slane %v1028_v9, %v1866_v33  ;;  %v1043_v24 = vrot.slane %v1029_v15, %v1866_v33  ;;  %v2049_v25 = vrot.slane %v811_v5, %v1857_v19 }
  0xaa   :  { %v163_v27 = vrot.slane %v1964_v6, 2  ;;  %v159_v32 = vrot.slane %v1966_v7, 2  ;;  %v1316_v63 = vcombine.low %v1308_v41, %v1315_v62  ;;  %v219_v45 = vrot.slane %v1964_v6, 4 }
  0xab   :  { %v251_v21 = vrot.slane %v1964_v6, 6  ;;  %v217_v40 = vrot.slane %v1966_v7, 4  ;;  %v1044_v30 = vcombine.low %v1036_v0, %v1043_v24  ;;  %v586_v39 = vcombine.low %v146_v29, %v148_v1 }
  0xac   :  { %1620 = vxpose.xlu1.b32.cont [2/16] (narrow) %v1316_v63, 8  ;;  %v1325_v49 = vrot.slane %v1674_v10, %v1866_v33  ;;  %v1332_v50 = vrot.slane %v1675_v26, %v1866_v33  ;;  %v1046_v51 = vcombine.low %v1931_v31, %v1949_v52  ;;  %v449_v47 = vrot.slane %v442_v23, %v1857_v19 }
  0xad   :  { %v2036_v16 = vpop.permute.xlu1 %177  ;;  %v2038_v17 = vpop.permute.xlu0 %173  ;;  %v2065_v59 = vrot.slane %v514_v46, %v1857_v19  ;;  %v249_v2 = vrot.slane %v1966_v7, 6  ;;  %v604_v29 = vcombine.low %v1966_v7, %v1964_v6  ;;  %1588 = vxpose.xlu0.b32.cont [2/16] (narrow) %v1044_v30, 8  ;;  %v676_v10 = vcombine.low %v159_v32, %v163_v27 }
  0xae   :  { %v1333_v26 = vcombine.low %v1325_v49, %v1332_v50  ;;  %v1053_v31 = vrot.slane %v1045_v14, %v1866_v33  ;;  %v1060_v52 = vrot.slane %v1046_v51, %v1866_v33  ;;  %v748_v5 = vcombine.low %v217_v40, %v219_v45 }
  0xaf   :  { %v171_v20 = vrot.slane %v1996_v34, 2  ;;  %v223_v9 = vrot.slane %v1996_v34, 4  ;;  %v255_v6 = vrot.slane %v1996_v34, 6  ;;  %v167_v7 = vrot.slane %v1998_v35, 2 }
  0xb0   :  { %v221_v15 = vrot.slane %v1998_v35, 4  ;;  %v253_v1 = vrot.slane %v1998_v35, 6  ;;  %1621 = vxpose.xlu1.b32.cont [3/16] (narrow) %v1333_v26, 8  ;;  %v1061_v41 = vcombine.low %v1053_v31, %v1060_v52  ;;  %v613_v42 = vcombine.low %v1998_v35, %v1996_v34 }
  0xb1   :  { %v2070_v44 = vpop.permute.xlu1 %185  ;;  %v2072_v4 = vpop.permute.xlu0 %181  ;;  %v1676_v53 = vcombine.high %v1969_v8, %v1993_v28  ;;  %v1677_v14 = vcombine.high %v2018_v61, %v449_v47  ;;  %v1062_v62 = vcombine.low %v1969_v8, %v1993_v28  ;;  %v2093_v23 = vrot.slane %v586_v39, %v1857_v19 }
  0xb2   :  { %v2096_v46 = vrot.slane %v604_v29, %v1857_v19  ;;  %v2098_v0 = vcombine.low %v249_v2, %v251_v21  ;;  %1589 = vxpose.xlu0.b32.cont [3/16] (narrow) %v1061_v41, 8  ;;  %v1063_v24 = vcombine.low %v2018_v61, %v449_v47  ;;  %v2102_v34 = vrot.slane %v676_v10, %v1857_v19 }
  0xb3   :  { %v2105_v35 = vrot.slane %v748_v5, %v1857_v19  ;;  %v1342_v27 = vrot.slane %v1676_v53, %v1866_v33  ;;  %v1349_v8 = vrot.slane %v1677_v14, %v1866_v33  ;;  %v685_v63 = vcombine.low %v167_v7, %v171_v20 }
  0xb4   :  { %v757_v45 = vcombine.low %v221_v15, %v223_v9  ;;  %v1070_v21 = vrot.slane %v1062_v62, %v1866_v33  ;;  %v1077_v61 = vrot.slane %v1063_v24, %v1866_v33  ;;  %v2116_v40 = vrot.slane %v613_v42, %v1857_v19 }
  0xb5   :  { %v2109_v28 = vpop.permute.xlu1 %193  ;;  %v2111_v32 = vpop.permute.xlu0 %189  ;;  %v829_v30 = vcombine.low %v253_v1, %v255_v6  ;;  %v179_v39 = vrot.slane %v2036_v16, 2  ;;  %v1350_v49 = vcombine.low %v1342_v27, %v1349_v8  ;;  %v227_v50 = vrot.slane %v2036_v16, 4 }
  0xb6   :  { %v175_v51 = vrot.slane %v2038_v17, 2  ;;  %v225_v47 = vrot.slane %v2038_v17, 4  ;;  %v1078_v2 = vcombine.low %v1070_v21, %v1077_v61  ;;  %v622_v29 = vcombine.low %v2038_v17, %v2036_v16 }
  0xb7   :  { %1622 = vxpose.xlu1.b32.cont [4/16] (narrow) %v1350_v49, 8  ;;  %v1678_v10 = vcombine.high %v1890_v56, %v1897_v60  ;;  %v1679_v26 = vcombine.high %v1935_v38, %v1954_v55  ;;  %v1079_v31 = vcombine.low %v1890_v56, %v1897_v60  ;;  %v2131_v52 = vrot.slane %v685_v63, %v1857_v19 }
  0xb8   :  { %v259_v5 = vrot.slane %v2036_v16, 6  ;;  %v257_v20 = vrot.slane %v2038_v17, 6  ;;  %1590 = vxpose.xlu0.b32.cont [4/16] (narrow) %v1078_v2, 8  ;;  %v1080_v9 = vcombine.low %v1935_v38, %v1954_v55  ;;  %v2138_v6 = vrot.slane %v757_v45, %v1857_v19 }
  0xb9   :  { %v2141_v7 = vrot.slane %v829_v30, %v1857_v19  ;;  %v1359_v15 = vrot.slane %v1678_v10, %v1866_v33  ;;  %v1366_v56 = vrot.slane %v1679_v26, %v1866_v33  ;;  %v2145_v60 = vpop.permute.xlu1 %201  ;;  %v2147_v1 = vpop.permute.xlu0 %197  ;;  %v694_v16 = vcombine.low %v175_v51, %v179_v39 }
  0xba   :  { %v766_v17 = vcombine.low %v225_v47, %v227_v50  ;;  %v1087_v41 = vrot.slane %v1079_v31, %v1866_v33  ;;  %v1094_v38 = vrot.slane %v1080_v9, %v1866_v33  ;;  %v2152_v55 = vrot.slane %v622_v29, %v1857_v19 }
  0xbb   :  { %v187_v42 = vrot.slane %v2070_v44, 2  ;;  %v183_v53 = vrot.slane %v2072_v4, 2  ;;  %v1367_v14 = vcombine.low %v1359_v15, %v1366_v56  ;;  %v2156_v62 = vcombine.low %v257_v20, %v259_v5 }
  0xbc   :  { %v231_v24 = vrot.slane %v2070_v44, 4  ;;  %v631_v27 = vcombine.low %v2072_v4, %v2070_v44  ;;  %v1095_v8 = vcombine.low %v1087_v41, %v1094_v38  ;;  %v229_v63 = vrot.slane %v2072_v4, 4 }
  0xbd   :  { %1623 = vxpose.xlu1.b32.cont [5/16] (narrow) %v1367_v14, 8  ;;  %v1680_v45 = vcombine.high %v1975_v13, %v2004_v43  ;;  %v1681_v21 = vcombine.high %v2023_v36, %v2065_v59  ;;  %v1096_v61 = vcombine.low %v1975_v13, %v2004_v43  ;;  %v2169_v30 = vrot.slane %v694_v16, %v1857_v19  ;;  %v2182_v43 = vpop.permute.xlu1 %209  ;;  %v2184_v29 = vpop.permute.xlu0 %205 }
  0xbe   :  { %v2172_v39 = vrot.slane %v766_v17, %v1857_v19  ;;  %v263_v49 = vrot.slane %v2070_v44, 6  ;;  %1591 = vxpose.xlu0.b32.cont [5/16] (narrow) %v1095_v8, 8  ;;  %v1097_v50 = vcombine.low %v2023_v36, %v2065_v59  ;;  %v261_v51 = vrot.slane %v2072_v4, 6 }
  0xbf   :  { %v2178_v47 = vcombine.low %v183_v53, %v187_v42  ;;  %v1376_v2 = vrot.slane %v1680_v45, %v1866_v33  ;;  %v1383_v13 = vrot.slane %v1681_v21, %v1866_v33  ;;  %v2187_v10 = vrot.slane %v631_v27, %v1857_v19 }
  0xc0   :  { %v649_v26 = vcombine.low %v2147_v1, %v2145_v60  ;;  %v1104_v36 = vrot.slane %v1096_v61, %v1866_v33  ;;  %v1111_v59 = vrot.slane %v1097_v50, %v1866_v33  ;;  %v2193_v31 = vcombine.low %v229_v63, %v231_v24 }
  0xc1   :  { %v195_v5 = vrot.slane %v2109_v28, 2  ;;  %v235_v20 = vrot.slane %v2109_v28, 4  ;;  %v1384_v9 = vcombine.low %v1376_v2, %v1383_v13  ;;  %v191_v15 = vrot.slane %v2111_v32, 2 }
  0xc2   :  { %v233_v56 = vrot.slane %v2111_v32, 4  ;;  %v1112_v16 = vcombine.low %v1104_v36, %v1111_v59  ;;  %v658_v17 = vcombine.low %v2184_v29, %v2182_v43  ;;  %v640_v41 = vcombine.low %v2111_v32, %v2109_v28 }
  0xc3   :  { %1624 = vxpose.xlu1.b32.cont [6/16] (narrow) %v1384_v9, 8  ;;  %v1682_v38 = vcombine.high %v1893_v57, %v1907_v3  ;;  %v1683_v42 = vcombine.high %v1944_v48, %v1957_v58  ;;  %v1113_v53 = vcombine.low %v1893_v57, %v1907_v3  ;;  %v203_v14 = vrot.slane %v2145_v60, 2 }
  0xc4   :  { %v199_v24 = vrot.slane %v2147_v1, 2  ;;  %v656_v27 = vrot.slane %v649_v26, %v1857_v19  ;;  %1592 = vxpose.xlu0.b32.cont [6/16] (narrow) %v1112_v16, 8  ;;  %v1114_v8 = vcombine.low %v1944_v48, %v1957_v58  ;;  %v211_v63 = vrot.slane %v2182_v43, 2 }
  0xc5   :  { %v207_v45 = vrot.slane %v2184_v29, 2  ;;  %v1393_v21 = vrot.slane %v1682_v38, %v1866_v33  ;;  %v1400_v61 = vrot.slane %v1683_v42, %v1866_v33  ;;  %v665_v57 = vrot.slane %v658_v17, %v1857_v19 }
  0xc6   :  { %v1121_v3 = vrot.slane %v1113_v53, %v1866_v33  ;;  %v1128_v50 = vrot.slane %v1114_v8, %v1866_v33  ;;  %v1684_v2 = vcombine.high %v1982_v18, %v2011_v54  ;;  %v1685_v48 = vcombine.high %v2028_v11, %v2093_v23 }
  0xc7   :  { %v1401_v13 = vcombine.low %v1393_v21, %v1400_v61  ;;  %v1130_v58 = vcombine.low %v1982_v18, %v2011_v54  ;;  %v1131_v26 = vcombine.low %v2028_v11, %v2093_v23  ;;  %v647_v36 = vrot.slane %v640_v41, %v1857_v19 }
  0xc8   :  { %v721_v59 = vcombine.low %v199_v24, %v203_v14  ;;  %v1129_v9 = vcombine.low %v1121_v3, %v1128_v50  ;;  %v1687_v16 = vcombine.high %v2116_v40, %v2152_v55  ;;  %v1410_v17 = vrot.slane %v1684_v2, %v1866_v33 }
  0xc9   :  { %1625 = vxpose.xlu1.b32.cont [7/16] (narrow) %v1401_v13, 8  ;;  %v1417_v38 = vrot.slane %v1685_v48, %v1866_v33  ;;  %v1145_v42 = vrot.slane %v1131_v26, %v1866_v33  ;;  %v1686_v18 = vcombine.high %v2031_v37, %v2096_v46  ;;  %v712_v54 = vcombine.low %v191_v15, %v195_v5 }
  0xca   :  { %1593 = vxpose.xlu0.b32.cont [7/16] (narrow) %v1129_v9, 8  ;;  %v1138_v11 = vrot.slane %v1130_v58, %v1866_v33  ;;  %v1147_v23 = vcombine.low %v2031_v37, %v2096_v46  ;;  %v1148_v41 = vcombine.low %v2116_v40, %v2152_v55  ;;  %v730_v53 = vcombine.low %v207_v45, %v211_v63 }
  0xcb   :  { %v1418_v14 = vcombine.low %v1410_v17, %v1417_v38  ;;  %v1434_v24 = vrot.slane %v1687_v16, %v1866_v33  ;;  %v1689_v8 = vcombine.high %v656_v27, %v665_v57  ;;  %v239_v21 = vrot.slane %v2145_v60, 4 }
  0xcc   :  { %v237_v61 = vrot.slane %v2147_v1, 4  ;;  %v1146_v3 = vcombine.low %v1138_v11, %v1145_v42  ;;  %v1162_v5 = vrot.slane %v1148_v41, %v1866_v33  ;;  %v728_v15 = vrot.slane %v721_v59, %v1857_v19 }
  0xcd   :  { %1626 = vxpose.xlu1.b32.cont [8/16] (narrow) %v1418_v14, 8  ;;  %v1427_v37 = vrot.slane %v1686_v18, %v1866_v33  ;;  %v1688_v46 = vcombine.high %v2187_v10, %v647_v36  ;;  %v1165_v40 = vcombine.low %v656_v27, %v665_v57  ;;  %v243_v55 = vrot.slane %v2182_v43, 4 }
  0xce   :  { %v241_v63 = vrot.slane %v2184_v29, 4  ;;  %1594 = vxpose.xlu0.b32.cont [8/16] (narrow) %v1146_v3, 8  ;;  %v1155_v45 = vrot.slane %v1147_v23, %v1866_v33  ;;  %v1164_v50 = vcombine.low %v2187_v10, %v647_v36  ;;  %v737_v2 = vrot.slane %v730_v53, %v1857_v19 }
  0xcf   :  { %v1435_v13 = vcombine.low %v1427_v37, %v1434_v24  ;;  %v1451_v48 = vrot.slane %v1689_v8, %v1866_v33  ;;  %v1691_v58 = vcombine.high %v2131_v52, %v2169_v30  ;;  %v710_v27 = vrot.slane %v2178_v47, %v1857_v19 }
  0xd0   :  { %v1163_v57 = vcombine.low %v1155_v45, %v1162_v5  ;;  %v1179_v26 = vrot.slane %v1165_v40, %v1866_v33  ;;  %v1182_v59 = vcombine.low %v2131_v52, %v2169_v30  ;;  %v719_v9 = vrot.slane %v712_v54, %v1857_v19 }
  0xd1   :  { %v793_v10 = vcombine.low %v237_v61, %v239_v21  ;;  %1627 = vxpose.xlu1.b32.cont [9/16] (narrow) %v1435_v13, 8  ;;  %v1444_v36 = vrot.slane %v1688_v46, %v1866_v33  ;;  %v1690_v16 = vcombine.high %v2034_v12, %v2102_v34  ;;  %v2268_v17 = vrot.slane %v2193_v31, %v1857_v19 }
  0xd2   :  { %v784_v47 = vcombine.low %v233_v56, %v235_v20  ;;  %1595 = vxpose.xlu0.b32.cont [9/16] (narrow) %v1163_v57, 8  ;;  %v1172_v52 = vrot.slane %v1164_v50, %v1866_v33  ;;  %v1181_v30 = vcombine.low %v2034_v12, %v2102_v34  ;;  %v802_v38 = vcombine.low %v241_v63, %v243_v55 }
  0xd3   :  { %v1452_v42 = vcombine.low %v1444_v36, %v1451_v48  ;;  %v1468_v18 = vrot.slane %v1691_v58, %v1866_v33  ;;  %v1693_v54 = vcombine.high %v728_v15, %v737_v2  ;;  %v271_v11 = vrot.slane %v2145_v60, 6 }
  0xd4   :  { %v1180_v31 = vcombine.low %v1172_v52, %v1179_v26  ;;  %v1196_v23 = vrot.slane %v1182_v59, %v1866_v33  ;;  %v1199_v41 = vcombine.low %v728_v15, %v737_v2  ;;  %v269_v53 = vrot.slane %v2147_v1, 6 }
  0xd5   :  { %v800_v20 = vrot.slane %v793_v10, %v1857_v19  ;;  %1628 = vxpose.xlu1.b32.cont [10/16] (narrow) %v1452_v42, 8  ;;  %v1461_v56 = vrot.slane %v1690_v16, %v1866_v33  ;;  %v1692_v14 = vcombine.high %v710_v27, %v719_v9  ;;  %v275_v12 = vrot.slane %v2182_v43, 6 }
  0xd6   :  { %v273_v34 = vrot.slane %v2184_v29, 6  ;;  %1596 = vxpose.xlu0.b32.cont [10/16] (narrow) %v1180_v31, 8  ;;  %v1189_v24 = vrot.slane %v1181_v30, %v1866_v33  ;;  %v1198_v60 = vcombine.low %v710_v27, %v719_v9  ;;  %v809_v8 = vrot.slane %v802_v38, %v1857_v19 }
  0xd7   :  { %v1469_v21 = vcombine.low %v1461_v56, %v1468_v18  ;;  %v1485_v61 = vrot.slane %v1693_v54, %v1866_v33  ;;  %v1695_v1 = vcombine.high %v2138_v6, %v2172_v39  ;;  %v267_v3 = vrot.slane %v2109_v28, 6 }
  0xd8   :  { %v1197_v5 = vcombine.low %v1189_v24, %v1196_v23  ;;  %v1213_v15 = vrot.slane %v1199_v41, %v1866_v33  ;;  %v1216_v43 = vcombine.low %v2138_v6, %v2172_v39  ;;  %v265_v29 = vrot.slane %v2111_v32, 6 }
  0xd9   :  { %v791_v37 = vrot.slane %v784_v47, %v1857_v19  ;;  %1629 = vxpose.xlu1.b32.cont [11/16] (narrow) %v1469_v21, 8  ;;  %v1478_v46 = vrot.slane %v1692_v14, %v1866_v33  ;;  %v1694_v40 = vcombine.high %v2041_v22, %v2105_v35  ;;  %v845_v55 = vrot.slane %v2156_v62, %v1857_v19 }
  0xda   :  { %v865_v28 = vcombine.low %v269_v53, %v271_v11  ;;  %1597 = vxpose.xlu0.b32.cont [11/16] (narrow) %v1197_v5, 8  ;;  %v1206_v63 = vrot.slane %v1198_v60, %v1866_v33  ;;  %v1215_v6 = vcombine.low %v2041_v22, %v2105_v35  ;;  %v874_v39 = vcombine.low %v273_v34, %v275_v12 }
  0xdb   :  { %v1486_v32 = vcombine.low %v1478_v46, %v1485_v61  ;;  %v1502_v45 = vrot.slane %v1695_v1, %v1866_v33  ;;  %v1697_v50 = vcombine.high %v800_v20, %v809_v8  ;;  %v827_v2 = vrot.slane %v2098_v0, %v1857_v19 }
  0xdc   :  { %v1214_v13 = vcombine.low %v1206_v63, %v1213_v15  ;;  %v1230_v48 = vrot.slane %v1216_v43, %v1866_v33  ;;  %v1233_v58 = vcombine.low %v800_v20, %v809_v8  ;;  %v847_v62 = vcombine.low %v261_v51, %v263_v49 }
  0xdd   :  { %v856_v27 = vcombine.low %v265_v29, %v267_v3  ;;  %1630 = vxpose.xlu1.b32.cont [12/16] (narrow) %v1486_v32, 8  ;;  %v1495_v22 = vrot.slane %v1694_v40, %v1866_v33  ;;  %v1696_v35 = vcombine.high %v2268_v17, %v791_v37  ;;  %v872_v57 = vrot.slane %v865_v28, %v1857_v19 }
  0xde   :  { %1598 = vxpose.xlu0.b32.cont [12/16] (narrow) %v1214_v13, 8  ;;  %v1223_v0 = vrot.slane %v1215_v6, %v1866_v33  ;;  %v1232_v26 = vcombine.low %v2268_v17, %v791_v37  ;;  %v881_v59 = vrot.slane %v874_v39, %v1857_v19  ;;  %v1519_v44 = vrot.slane %v1697_v50, %v1866_v33 }
  0xdf   :  { %v1503_v9 = vcombine.low %v1495_v22, %v1502_v45  ;;  %v1699_v4 = vcombine.high %v2141_v7, %v845_v55  ;;  %v1247_v51 = vrot.slane %v1233_v58, %v1866_v33  ;;  %v1250_v10 = vcombine.low %v2141_v7, %v845_v55 }
  0xe0   :  { %v1231_v49 = vcombine.low %v1223_v0, %v1230_v48  ;;  %v854_v36 = vrot.slane %v847_v62, %v1857_v19  ;;  %v863_v16 = vrot.slane %v856_v27, %v1857_v19  ;;  %v1512_v47 = vrot.slane %v1696_v35, %v1866_v33 }
  0xe1   :  { %1631 = vxpose.xlu1.b32.cont [13/16] (narrow) %v1503_v9, 8  ;;  %v1698_v17 = vcombine.high %v2049_v25, %v827_v2  ;;  %v1240_v52 = vrot.slane %v1232_v26, %v1866_v33  ;;  %v1249_v30 = vcombine.low %v2049_v25, %v827_v2  ;;  %v1536_v42 = vrot.slane %v1699_v4, %v1866_v33 }
  0xe2   :  { %1599 = vxpose.xlu0.b32.cont [13/16] (narrow) %v1231_v49, 8  ;;  %v1520_v38 = vcombine.low %v1512_v47, %v1519_v44  ;;  %v1701_v18 = vcombine.high %v872_v57, %v881_v59  ;;  %v1264_v7 = vrot.slane %v1250_v10, %v1866_v33  ;;  %v1267_v11 = vcombine.low %v872_v57, %v881_v59 }
  0xe3   :  { %v1248_v54 = vcombine.low %v1240_v52, %v1247_v51  ;;  %v1529_v19 = vrot.slane %v1698_v17, %v1866_v33  ;;  %v1700_v31 = vcombine.high %v854_v36, %v863_v16  ;;  %v1257_v23 = vrot.slane %v1249_v30, %v1866_v33 }
  0xe4   :  { %v1266_v41 = vcombine.low %v854_v36, %v863_v16  ;;  %v1553_v20 = vrot.slane %v1701_v18, %v1866_v33  ;;  %v1281_v56 = vrot.slane %v1267_v11, %v1866_v33 }
  0xe5   :  { %1632 = vxpose.xlu1.b32.cont [14/16] (narrow) %v1520_v38, 8  ;;  %v1537_v53 = vcombine.low %v1529_v19, %v1536_v42  ;;  %v1265_v25 = vcombine.low %v1257_v23, %v1264_v7  ;;  %v1546_v14 = vrot.slane %v1700_v31, %v1866_v33 }
  0xe6   :  { %1600 = vxpose.xlu0.b32.cont [14/16] (narrow) %v1248_v54, 8  ;;  %v1274_v12 = vrot.slane %v1266_v41, %v1866_v33 }
  0xe7   :  { %v1554_v34 = vcombine.low %v1546_v14, %v1553_v20 }
  0xe8   :  { %v1282_v24 = vcombine.low %v1274_v12, %v1281_v56 }
  0xe9   :  { %1633 = vxpose.xlu1.b32.cont [15/16] (narrow) %v1537_v53, 8 }
  0xea   :  { %1601 = vxpose.xlu0.b32.cont [15/16] (narrow) %v1265_v25, 8 }
  0xed   :  { %1634 = vxpose.xlu1.b32.end [16/16] (narrow) %v1554_v34, 8 }
  0xee   :  { %1602 = vxpose.xlu0.b32.end [16/16] (narrow) %v1282_v24, 8 }
 0x131   :  { %v1635_v60 = vpop.trf.xlu1 }
 0x132   :  { %1652 = vst [vmem:[#allocation5 + $0x8] sm:$0xff] %v1635_v60  ;;  %v1603_v8 = vpop.trf.xlu0 }
 0x133   :  { %1651 = vst [vmem:[#allocation5] sm:$0xff] %v1603_v8 }
 0x134   :  { %1755 = shalt.err (!%p1752_p12)
}
 0x135   :  { %s1756_s8 = scalar_lea.hbm %s2350_s1, 256 }
 0x136   :  { %p1757_p13 = scmp.ne.s32.totalorder %s2350_s1, %s1756_s8  ;;  %p1760_p0 = scmp.lt.u32.totalorder %s1756_s8, %s2350_s1 }
 0x138   :  { %p1762_p1 = pnand %p1760_p0, %p1757_p13 }
 0x13a   :  { %1765 = shalt.err (!%p1762_p1)
}
 0x13b   :  { %s1789_s13 = smov 128  }
 0x13c   :  { %1664 = dma.vmem_to_hbm [thread:$0]  %s1659_s4, 256, %s2350_s1, [#allocation4], %s1789_s13, %s1789_s13, %s1785_s2  }
 0x13d   :  { %1768 = dma.done.wait [#allocation4], 256  }
 0x13e   :  { %1769 = vsyncadd [#allocation4], 4294967040 }
 0x13f   :  { %1668 = vsyncpa [#allocation3], 1 }
 0x140   :  { %1669 = vsyncpa [#allocation4], 1 }

</bundles_post_ra>
